<compile_context>
chip_gen: v7x
topology: tpu7x:2x2x1
jax: 0.10.0
libtpu: 0.0.40
codegen_flags: <defaults>
</compile_context>

<pallas_src>
import functools

import jax
import jax.numpy as jnp
from jax.experimental import pallas as pl
from jax.experimental.pallas import tpu as pltpu


def _round_up(x, m):
    return ((x + m - 1) // m) * m


def _mf_dot_kernel(u_ref, i_ref, o_ref):
    # u_ref / i_ref: (F, BT) VMEM tiles -- batch on lanes, factors on sublanes.
    # Upcast inside the kernel (keeps HBM traffic at the table dtype width).
    prod = u_ref[...].astype(jnp.float32) * i_ref[...].astype(jnp.float32)
    # Sublane (XLU) reduce over factors -> lane-dense (1, BT) unmasked store.
    o_ref[...] = jnp.sum(prod, axis=0, keepdims=True)


@functools.partial(jax.jit, static_argnames=("block_batch",))
def matrix_factorization_forward(user_table, item_table, user_ids, item_ids,
                                 *, block_batch=None):
    """user_table: (num_users, F), item_table: (num_items, F),
    user_ids/item_ids: (B,) int  ->  (B,) f32 predicted ratings."""
    B = int(user_ids.shape[0])
    F = int(user_table.shape[1])

    # Coalesced embedding gathers in XLA, batch moved to the lane axis.
    u = jnp.take(user_table, user_ids, axis=0).T  # (F, B)
    i = jnp.take(item_table, item_ids, axis=0).T  # (F, B)

    itemsize = jnp.dtype(u.dtype).itemsize

    # Batch tile: multiple of 128 lanes, sized to an ~8 MiB VMEM budget
    # (2 inputs x 2 pipeline buffers), capped at the padded batch.
    if block_batch is None:
        budget = 8 * 1024 * 1024
        bytes_per_col = 2 * 2 * F * itemsize
        block_batch = max(128, (budget // bytes_per_col) // 128 * 128)
    bt = min(_round_up(block_batch, 128), _round_up(B, 128))
    b_padded = _round_up(B, bt)
    pad = b_padded - B
    if pad:
        u = jnp.pad(u, ((0, 0), (0, pad)))
        i = jnp.pad(i, ((0, 0), (0, pad)))

    num_tiles = b_padded // bt

    out = pl.pallas_call(
        _mf_dot_kernel,
        out_shape=jax.ShapeDtypeStruct((1, b_padded), jnp.float32),
        grid=(num_tiles,),
        in_specs=[
            pl.BlockSpec((F, bt), lambda b: (0, b)),
            pl.BlockSpec((F, bt), lambda b: (0, b)),
        ],
        out_specs=pl.BlockSpec((1, bt), lambda b: (0, b)),
        compiler_params=pltpu.CompilerParams(
            dimension_semantics=("parallel",)),
    )(u, i)

    return out[0, :B]


if __name__ == "__main__":
    num_users, num_items, num_factors = 10, 12, 32
    batch = 8

    key = jax.random.PRNGKey(0)
    k_u, k_i, k_uid, k_iid = jax.random.split(key, 4)

    # nn.Embedding default init: N(0, 1).
    user_table = jax.random.normal(k_u, (num_users, num_factors), jnp.float32)
    item_table = jax.random.normal(k_i, (num_items, num_factors), jnp.float32)

    user_ids = jax.random.randint(k_uid, (batch,), 0, num_users, jnp.int32)
    item_ids = jax.random.randint(k_iid, (batch,), 0, num_items, jnp.int32)

    pred = matrix_factorization_forward(user_table, item_table,
                                        user_ids, item_ids)
    pred = jax.block_until_ready(pred)

    # Pure-JAX reference check.
    ref = jnp.sum(user_table[user_ids] * item_table[item_ids], axis=1)
    assert pred.shape == (batch,)
    assert jnp.allclose(pred, ref, atol=1e-5, rtol=1e-5)

    print("KERNEL_OK")
</pallas_src>

<mosaic_0001>
module attributes {stable_mosaic.version = 11 : i64} {
  func.func @_mf_dot_kernel(%arg0: i32, %arg1: memref<32x128xf32, #tpu.memory_space<vmem>>, %arg2: memref<32x128xf32, #tpu.memory_space<vmem>>, %arg3: memref<1x128xf32, #tpu.memory_space<vmem>>) attributes {dimension_semantics = [#tpu.dimension_semantics<parallel>], iteration_bounds = array<i64: 1>, scalar_prefetch = 0 : i64, scratch_operands = 0 : i64, tpu.core_type = #tpu.core_type<tc>, window_params = [{transform_indices = @transform_0, window_bounds = array<i64: 32, 128>}, {transform_indices = @transform_1, window_bounds = array<i64: 32, 128>}, {transform_indices = @transform_2, window_bounds = array<i64: 1, 128>}]} {
    %c0 = arith.constant 0 : index
    %c0_0 = arith.constant 0 : index
    %0 = vector.load %arg1[%c0, %c0_0] : memref<32x128xf32, #tpu.memory_space<vmem>>, vector<32x128xf32>
    %c0_1 = arith.constant 0 : index
    %c0_2 = arith.constant 0 : index
    %1 = vector.load %arg2[%c0_1, %c0_2] : memref<32x128xf32, #tpu.memory_space<vmem>>, vector<32x128xf32>
    %2 = arith.mulf %0, %1 : vector<32x128xf32>
    %cst = arith.constant dense<0.000000e+00> : vector<128xf32>
    %3 = vector.multi_reduction <add>, %2, %cst [0] : vector<32x128xf32> to vector<128xf32>
    %4 = vector.shape_cast %3 : vector<128xf32> to vector<1x128xf32>
    %c0_3 = arith.constant 0 : index
    %c0_4 = arith.constant 0 : index
    %5 = vector.load %arg3[%c0_3, %c0_4] : memref<1x128xf32, #tpu.memory_space<vmem>>, vector<1x128xf32>
    tpu.vector_store %arg3[%c0_3, %c0_4], %4 {strides = array<i32>} : memref<1x128xf32, #tpu.memory_space<vmem>>, vector<1x128xf32>,
    return
  }
  func.func @transform_0(%arg0: i32) -> (i32, i32) {
    %c0_i32 = arith.constant 0 : i32
    %c0_i32_0 = arith.constant 0 : i32
    return %c0_i32, %arg0 : i32, i32
  }
  func.func @transform_1(%arg0: i32) -> (i32, i32) {
    %c0_i32 = arith.constant 0 : i32
    %c0_i32_0 = arith.constant 0 : i32
    return %c0_i32, %arg0 : i32, i32
  }
  func.func @transform_2(%arg0: i32) -> (i32, i32) {
    %c0_i32 = arith.constant 0 : i32
    %c0_i32_0 = arith.constant 0 : i32
    return %c0_i32, %arg0 : i32, i32
  }
}

</mosaic_0001>

<bundles_post_ra>
// kernel: matrix_factorization_forward.1
= control target key start
LH: loop header
LB: loop body
LE: loop exit
PB: predicated region body
PF: predicated region fallthrough
CT: control target
= control target key end

     0   :  { %s79_s0 = inlined_call_operand.vmem [shape: f32[32,128], index: 0, kind: input, shape index: {}]   ;;  %s80_s1 = inlined_call_operand.vmem [shape: f32[32,128], index: 1, kind: input, shape index: {}]   ;;  %s81_s2 = inlined_call_operand.vmem [shape: f32[1,128], index: 2, kind: output, shape index: {}]  }
   0x1   :  { %v11_v0 = vld [vmem:[%s79_s0] sm:$0xff]  ;;  %v12_v1 = vld [vmem:[%s79_s0 + $0x8] sm:$0xff]  ;;  %v13_v2 = vld [vmem:[%s79_s0 + $0x10] sm:$0xff] }
   0x2   :  { %v14_v3 = vld [vmem:[%s79_s0 + $0x18] sm:$0xff]  ;;  %v15_v4 = vld [vmem:[%s80_s1] sm:$0xff]  ;;  %v16_v5 = vld [vmem:[%s80_s1 + $0x8] sm:$0xff] }
   0x3   :  { %v17_v6 = vld [vmem:[%s80_s1 + $0x10] sm:$0xff]  ;;  %v18_v7 = vld [vmem:[%s80_s1 + $0x18] sm:$0xff]  ;;  %v19_v8 = vmul.f32 %v15_v4, %v11_v0  ;;  %v20_v9 = vmul.f32 %v16_v5, %v12_v1 }
   0x4   :  { %v21_v10 = vmul.f32 %v17_v6, %v13_v2  ;;  %v22_v11 = vmul.f32 %v18_v7, %v14_v3 }
   0x5   :  { %v23_v12 = vadd.f32 %v20_v9, %v19_v8 }
   0x7   :  { %v24_v13 = vadd.f32 %v23_v12, %v21_v10 }
   0x9   :  { %v25_v14 = vadd.f32 %v24_v13, %v22_v11 }
   0xb   :  { %v26_v15 = vrot.slane %v25_v14, 4 }
   0xd   :  { %v27_v16 = vadd.f32 %v26_v15, %v25_v14 }
   0xf   :  { %v28_v17 = vrot.slane %v27_v16, 2 }
  0x11   :  { %v29_v18 = vadd.f32 %v28_v17, %v27_v16 }
  0x13   :  { %v30_v19 = vrot.slane %v29_v18, 1 }
  0x15   :  { %v31_v20 = vadd.f32 %v30_v19, %v29_v18 }
  0x17   :  { %32 = vst [vmem:[%s81_s2] sm:$0x1] %v31_v20 }

</bundles_post_ra>
